<compile_context>
chip_gen: v5e
topology: v5e:2x2
jax: 0.10.0
libtpu: 0.0.40
codegen_flags: <defaults>
</compile_context>

<pallas_src>
import functools

import jax
import jax.numpy as jnp
import numpy as np
from jax.experimental import pallas as pl
from jax.experimental.pallas import tpu as pltpu


def _test_method_kernel(n_worker, n_label, slab_width,
                        hidden_sen_ref, worker_emb_ref, crowd_mask_ref, abi_flat_ref,
                        slab_ref):
    W, L = n_worker, n_label
    WL = W * L
    used = L + W + 2 * WL

    hs = hidden_sen_ref[...]          # (B, H)
    we = worker_emb_ref[...]          # (W, H)
    cm = crowd_mask_ref[...]          # (B, W, L)
    abi = abi_flat_ref[...]           # (L, W*L)  lane groups of L per worker
    B = hs.shape[0]

    # 0/1 group selector: G[g, w] = 1 iff flat lane g belongs to worker w's group.
    gi = jax.lax.broadcasted_iota(jnp.int32, (WL, W), 0)
    wi = jax.lax.broadcasted_iota(jnp.int32, (WL, W), 1)
    G = jnp.where((gi >= wi * L) & (gi < (wi + 1) * L),
                  jnp.float32(1.0), jnp.float32(0.0)).astype(jnp.float32)

    # ---- attention over workers -------------------------------------------
    crowd_s = jnp.sum(cm, axis=2)                                     # (B, W)
    att = jax.lax.dot_general(hs, we, (((1,), (1,)), ((), ())),       # hs @ we^T
                              preferred_element_type=jnp.float32)     # (B, W)
    att = att * crowd_s
    # Exactly the torch module's check: att_weight[i, j] == 0 -> -99999999.
    att = jnp.where(att == 0.0, jnp.float32(-99999999.0), att)
    att = att - jnp.max(att, axis=1, keepdims=True)
    e_att = jnp.exp(att)
    att_w = e_att * pl.reciprocal(jnp.sum(e_att, axis=1, keepdims=True),
                                  approx=False)                        # (B, W)

    # ---- f_score[b, l] = sum_w att_w[b, w] * crowd_mask[b, w, l] ------------
    f = jnp.sum(att_w[:, :, None] * cm, axis=1)                        # (B, L)

    # ---- worker-ability softmax over each L-lane group of abi ---------------
    # Subtracting the full-row max is valid: it is constant within every group.
    e_abi = jnp.exp(abi - jnp.max(abi, axis=1, keepdims=True))         # (L, W*L)
    abi_gsum = jnp.dot(e_abi, G, preferred_element_type=jnp.float32)   # (L, W)
    abi_den = jax.lax.dot_general(pl.reciprocal(abi_gsum, approx=False), G,
                                  (((1,), (1,)), ((), ())),            # G^T bcast
                                  preferred_element_type=jnp.float32)  # (L, W*L)
    abi_soft = e_abi * abi_den                                         # (L, W*L)

    # ---- ob_labels: one (B, L) @ (L, W*L) matmul ----------------------------
    # ob[b, w*L + l] == ob_labels[b, l, w]
    ob = jnp.dot(f, abi_soft, preferred_element_type=jnp.float32)      # (B, W*L)

    # ---- softmax over labels (per worker group), issued once ----------------
    e_ob = jnp.exp(ob - jnp.max(ob, axis=1, keepdims=True))
    ob_gsum = jnp.dot(e_ob, G, preferred_element_type=jnp.float32)     # (B, W)
    ob_den = jax.lax.dot_general(pl.reciprocal(ob_gsum, approx=False), G,
                                 (((1,), (1,)), ((), ())),
                                 preferred_element_type=jnp.float32)   # (B, W*L)
    ob_soft = e_ob * ob_den                                            # (B, W*L)

    # ---- single lane-dense packed output store ------------------------------
    pieces = [f, att_w, ob, ob_soft]
    pad_w = slab_width - used
    if pad_w:                                   # static Python check
        pieces.append(jnp.zeros((B, pad_w), jnp.float32))
    slab_ref[...] = jnp.concatenate(pieces, axis=-1)


def test_method_forward(hidden_sen, worker_embedding, worker_abi, crowd_mask):
    B, H = hidden_sen.shape
    _, W, L = crowd_mask.shape
    WL = W * L
    used = L + W + 2 * WL
    slab_width = max(128, ((used + 127) // 128) * 128)

    # Layout glue only: (W, L, L) -> (L, W, L) -> (L, W*L) w-major lane groups.
    abi_flat = jnp.transpose(worker_abi, (1, 0, 2)).reshape(L, WL)

    kernel = functools.partial(_test_method_kernel, W, L, slab_width)
    vmem = pltpu.MemorySpace.VMEM

    slab = pl.pallas_call(
        kernel,
        out_shape=jax.ShapeDtypeStruct((B, slab_width), jnp.float32),
        in_specs=[pl.BlockSpec(memory_space=vmem)] * 4,
        out_specs=pl.BlockSpec(memory_space=vmem),
    )(hidden_sen, worker_embedding, crowd_mask, abi_flat)

    # Glue: slice the packed slab and restore the torch output layouts.
    f_score = slab[:, :L]
    att_weight = slab[:, L:L + W]
    ob_flat = slab[:, L + W:L + W + WL]
    ob_soft_flat = slab[:, L + W + WL:used]
    ob_labels = jnp.transpose(ob_flat.reshape(B, W, L), (0, 2, 1))
    ob_labels_soft = jnp.transpose(ob_soft_flat.reshape(B, W, L), (0, 2, 1))
    return f_score, ob_labels, ob_labels_soft, att_weight


def _reference(hidden_sen, worker_embedding, worker_abi, crowd_mask):
    # Pure-JAX mirror of the torch module (float32).
    crowd_s = jnp.sum(crowd_mask, axis=2)
    att = jnp.matmul(hidden_sen, worker_embedding.T) * crowd_s
    att = jnp.where(att == 0.0, -99999999.0, att)
    att_w = jax.nn.softmax(att, axis=1)
    f = jnp.einsum("bw,bwl->bl", att_w, crowd_mask)
    abi_soft = jax.nn.softmax(worker_abi, axis=2)
    ob = jnp.einsum("bk,wkl->blw", f, abi_soft)
    ob_soft = jax.nn.softmax(ob, axis=1)
    return f, ob, ob_soft, att_w


if __name__ == "__main__":
    # small shapes consistent with the module
    B, H, W, L = 8, 16, 4, 6   # batch, hidden_size, n_worker, n_label

    key = jax.random.PRNGKey(0)
    k1, k2, k3, k4, k5 = jax.random.split(key, 5)

    hidden_sen = jax.random.normal(k1, (B, H), dtype=jnp.float32)
    worker_embedding = jax.random.normal(k2, (W, H), dtype=jnp.float32) * 0.1
    worker_abi = jax.random.normal(k3, (W, L, L), dtype=jnp.float32)

    # crowd_mask: one-hot label votes; zero-out some (sample, worker) pairs so
    # the "worker gave no label" masking branch is exercised.
    labels = jax.random.randint(k4, (B, W), 0, L)
    crowd_mask = jax.nn.one_hot(labels, L, dtype=jnp.float32)      # (B, W, L)
    present = (jax.random.uniform(k5, (B, W)) > 0.3).astype(jnp.float32)
    crowd_mask = crowd_mask * present[:, :, None]

    outs = test_method_forward(hidden_sen, worker_embedding, worker_abi, crowd_mask)
    outs = jax.block_until_ready(outs)

    refs = _reference(hidden_sen, worker_embedding, worker_abi, crowd_mask)
    for o, r in zip(outs, refs):
        np.testing.assert_allclose(np.asarray(o), np.asarray(r), rtol=1e-5, atol=1e-5)

    print("KERNEL_OK")
</pallas_src>

<mosaic_0001>
module attributes {stable_mosaic.version = 11 : i64} {
  func.func @_test_method_kernel(%arg0: memref<8x16xf32, #tpu.memory_space<vmem>>, %arg1: memref<4x16xf32, #tpu.memory_space<vmem>>, %arg2: memref<8x4x6xf32, #tpu.memory_space<vmem>>, %arg3: memref<6x24xf32, #tpu.memory_space<vmem>>, %arg4: memref<8x128xf32, #tpu.memory_space<vmem>>) attributes {dimension_semantics = [], scalar_prefetch = 0 : i64, scratch_operands = 0 : i64, tpu.core_type = #tpu.core_type<tc>} {
    %c0 = arith.constant 0 : index
    %c0_0 = arith.constant 0 : index
    %0 = vector.load %arg0[%c0, %c0_0] : memref<8x16xf32, #tpu.memory_space<vmem>>, vector<8x16xf32>
    %c0_1 = arith.constant 0 : index
    %c0_2 = arith.constant 0 : index
    %1 = vector.load %arg1[%c0_1, %c0_2] : memref<4x16xf32, #tpu.memory_space<vmem>>, vector<4x16xf32>
    %c0_3 = arith.constant 0 : index
    %c0_4 = arith.constant 0 : index
    %c0_5 = arith.constant 0 : index
    %2 = vector.load %arg2[%c0_3, %c0_4, %c0_5] : memref<8x4x6xf32, #tpu.memory_space<vmem>>, vector<8x4x6xf32>
    %c0_6 = arith.constant 0 : index
    %c0_7 = arith.constant 0 : index
    %3 = vector.load %arg3[%c0_6, %c0_7] : memref<6x24xf32, #tpu.memory_space<vmem>>, vector<6x24xf32>
    %4 = tpu.iota {dimensions = array<i32: 0>} : vector<24x4xi32>
    %5 = tpu.iota {dimensions = array<i32: 1>} : vector<24x4xi32>
    %c6_i32 = arith.constant 6 : i32
    %6 = vector.broadcast %c6_i32 : i32 to vector<24x4xi32>
    %7 = arith.muli %5, %6 : vector<24x4xi32>
    %8 = arith.cmpi sge, %4, %7 : vector<24x4xi32>
    %c1_i32 = arith.constant 1 : i32
    %9 = vector.broadcast %c1_i32 : i32 to vector<24x4xi32>
    %10 = arith.addi %5, %9 : vector<24x4xi32>
    %c6_i32_8 = arith.constant 6 : i32
    %11 = vector.broadcast %c6_i32_8 : i32 to vector<24x4xi32>
    %12 = arith.muli %10, %11 : vector<24x4xi32>
    %13 = arith.cmpi slt, %4, %12 : vector<24x4xi32>
    %14 = arith.andi %8, %13 : vector<24x4xi1>
    %cst = arith.constant 1.000000e+00 : f32
    %cst_9 = arith.constant 0.000000e+00 : f32
    %15 = vector.broadcast %cst : f32 to vector<24x4xf32>
    %16 = vector.broadcast %cst_9 : f32 to vector<24x4xf32>
    %17 = arith.select %14, %15, %16 : vector<24x4xi1>, vector<24x4xf32>
    %cst_10 = arith.constant dense<0.000000e+00> : vector<8x4xf32>
    %18 = vector.multi_reduction <add>, %2, %cst_10 [2] : vector<8x4x6xf32> to vector<8x4xf32>
    %cst_11 = arith.constant dense<0.000000e+00> : vector<8x4xf32>
    %19 = tpu.matmul %0, %1, %cst_11 {dimension_numbers = #tpu.dot_dimension_numbers<[1], [1], [0], [0], [0, 0, 1, 0], [], []>} : vector<8x16xf32>, vector<4x16xf32>, vector<8x4xf32> -> vector<8x4xf32>
    %20 = arith.mulf %19, %18 : vector<8x4xf32>
    %cst_12 = arith.constant 0.000000e+00 : f32
    %21 = vector.broadcast %cst_12 : f32 to vector<8x4xf32>
    %22 = arith.cmpf oeq, %20, %21 : vector<8x4xf32>
    %cst_13 = arith.constant -1.000000e+08 : f32
    %23 = vector.broadcast %cst_13 : f32 to vector<8x4xf32>
    %24 = arith.select %22, %23, %20 : vector<8x4xi1>, vector<8x4xf32>
    %cst_14 = arith.constant dense<0xFF800000> : vector<8xf32>
    %25 = vector.multi_reduction <maximumf>, %24, %cst_14 [1] : vector<8x4xf32> to vector<8xf32>
    %26 = vector.shape_cast %25 : vector<8xf32> to vector<8x1xf32>
    %27 = vector.broadcast %26 : vector<8x1xf32> to vector<8x4xf32>
    %28 = arith.subf %24, %27 : vector<8x4xf32>
    %29 = math.exp %28 : vector<8x4xf32>
    %cst_15 = arith.constant dense<0.000000e+00> : vector<8xf32>
    %30 = vector.multi_reduction <add>, %29, %cst_15 [1] : vector<8x4xf32> to vector<8xf32>
    %31 = vector.shape_cast %30 : vector<8xf32> to vector<8x1xf32>
    %32 = tpu.reciprocal %31 : vector<8x1xf32> -> vector<8x1xf32>
    %33 = vector.broadcast %32 : vector<8x1xf32> to vector<8x4xf32>
    %34 = arith.mulf %29, %33 : vector<8x4xf32>
    %35 = vector.shape_cast %34 : vector<8x4xf32> to vector<8x4x1xf32>
    %36 = vector.broadcast %35 : vector<8x4x1xf32> to vector<8x4x6xf32>
    %37 = arith.mulf %36, %2 : vector<8x4x6xf32>
    %cst_16 = arith.constant dense<0.000000e+00> : vector<8x6xf32>
    %38 = vector.multi_reduction <add>, %37, %cst_16 [1] : vector<8x4x6xf32> to vector<8x6xf32>
    %cst_17 = arith.constant dense<0xFF800000> : vector<6xf32>
    %39 = vector.multi_reduction <maximumf>, %3, %cst_17 [1] : vector<6x24xf32> to vector<6xf32>
    %40 = vector.shape_cast %39 : vector<6xf32> to vector<6x1xf32>
    %41 = vector.broadcast %40 : vector<6x1xf32> to vector<6x24xf32>
    %42 = arith.subf %3, %41 : vector<6x24xf32>
    %43 = math.exp %42 : vector<6x24xf32>
    %cst_18 = arith.constant dense<0.000000e+00> : vector<6x4xf32>
    %44 = tpu.matmul %43, %17, %cst_18 {dimension_numbers = #tpu.dot_dimension_numbers<[1], [0], [0], [1], [0, 0, 1, 1], [], []>} : vector<6x24xf32>, vector<24x4xf32>, vector<6x4xf32> -> vector<6x4xf32>
    %45 = tpu.reciprocal %44 : vector<6x4xf32> -> vector<6x4xf32>
    %cst_19 = arith.constant dense<0.000000e+00> : vector<6x24xf32>
    %46 = tpu.matmul %45, %17, %cst_19 {dimension_numbers = #tpu.dot_dimension_numbers<[1], [1], [0], [0], [0, 0, 1, 0], [], []>} : vector<6x4xf32>, vector<24x4xf32>, vector<6x24xf32> -> vector<6x24xf32>
    %47 = arith.mulf %43, %46 : vector<6x24xf32>
    %cst_20 = arith.constant dense<0.000000e+00> : vector<8x24xf32>
    %48 = tpu.matmul %38, %47, %cst_20 {dimension_numbers = #tpu.dot_dimension_numbers<[1], [0], [0], [1], [0, 0, 1, 1], [], []>} : vector<8x6xf32>, vector<6x24xf32>, vector<8x24xf32> -> vector<8x24xf32>
    %cst_21 = arith.constant dense<0xFF800000> : vector<8xf32>
    %49 = vector.multi_reduction <maximumf>, %48, %cst_21 [1] : vector<8x24xf32> to vector<8xf32>
    %50 = vector.shape_cast %49 : vector<8xf32> to vector<8x1xf32>
    %51 = vector.broadcast %50 : vector<8x1xf32> to vector<8x24xf32>
    %52 = arith.subf %48, %51 : vector<8x24xf32>
    %53 = math.exp %52 : vector<8x24xf32>
    %cst_22 = arith.constant dense<0.000000e+00> : vector<8x4xf32>
    %54 = tpu.matmul %53, %17, %cst_22 {dimension_numbers = #tpu.dot_dimension_numbers<[1], [0], [0], [1], [0, 0, 1, 1], [], []>} : vector<8x24xf32>, vector<24x4xf32>, vector<8x4xf32> -> vector<8x4xf32>
    %55 = tpu.reciprocal %54 : vector<8x4xf32> -> vector<8x4xf32>
    %cst_23 = arith.constant dense<0.000000e+00> : vector<8x24xf32>
    %56 = tpu.matmul %55, %17, %cst_23 {dimension_numbers = #tpu.dot_dimension_numbers<[1], [1], [0], [0], [0, 0, 1, 0], [], []>} : vector<8x4xf32>, vector<24x4xf32>, vector<8x24xf32> -> vector<8x24xf32>
    %57 = arith.mulf %53, %56 : vector<8x24xf32>
    %cst_24 = arith.constant 0.000000e+00 : f32
    %58 = vector.broadcast %cst_24 : f32 to vector<8x70xf32>
    %59 = tpu.concatenate %38, %34, %48, %57, %58 in 1 : vector<8x6xf32>, vector<8x4xf32>, vector<8x24xf32>, vector<8x24xf32>, vector<8x70xf32> -> vector<8x128xf32>
    %c0_25 = arith.constant 0 : index
    %c0_26 = arith.constant 0 : index
    %60 = vector.load %arg4[%c0_25, %c0_26] : memref<8x128xf32, #tpu.memory_space<vmem>>, vector<8x128xf32>
    tpu.vector_store %arg4[%c0_25, %c0_26], %59 {strides = array<i32>} : memref<8x128xf32, #tpu.memory_space<vmem>>, vector<8x128xf32>,
    return
  }
}

</mosaic_0001>

<bundles_post_ra>
// kernel: tpu_custom_call.1
= control target key start
LH: loop header
LB: loop body
LE: loop exit
PB: predicated region body
PF: predicated region fallthrough
CT: control target
= control target key end

     0   :  { %vm281_vm0 = vcmask 193536   ;;  %vm50_vm1 = vcmask 44032   ;;  %vm75_vm2 = vcmask 130048   ;;  %s758_s0 = inlined_call_operand.vmem [shape: f32[8,16], index: 0, kind: input, shape index: {}]   ;;  %s759_s1 = inlined_call_operand.vmem [shape: f32[4,16], index: 1, kind: input, shape index: {}]   ;;  %s760_s2 = inlined_call_operand.vmem [shape: f32[8,4,6], index: 2, kind: input, shape index: {}]   ;;  %s761_s3 = inlined_call_operand.vmem [shape: f32[6,24], index: 3, kind: input, shape index: {}]   ;;  %s762_s4 = inlined_call_operand.hbm [shape: f32[8,128], index: 4, kind: output, shape index: {}]  }
   0x1   :  { %v606_v0 = vld [vmem:[%s761_s3] sm:$0x3f]  ;;  %v619_v4 = vld [vmem:[%s760_s2 + $0xc] sm:$0xf]  ;;  %v637_v9 = vld [vmem:[%s760_s2 + $0x8] sm:$0xf] }
   0x2   :  { %v611_v1 = vld [vmem:[%s760_s2 + $0x4] sm:$0xf]  ;;  %v282_v2 = vsel %vm281_vm0, %v606_v0, -inf  ;;  %v60_v5 = vsel %vm50_vm1, %v619_v4, 0.0  ;;  %v19_v6 = vld [vmem:[%s759_s1] sm:$0xf] }
   0x3   :  { %v54_v3 = vsel %vm50_vm1, %v611_v1, 0.0  ;;  %283 = vmax.xlane.f32.xlu0 %v282_v2  ;;  %61 = vadd.xlane.f32.xlu2 %v60_v5  ;;  %v18_v7 = vld [vmem:[%s758_s0] sm:$0xff]  ;;  %v642_v10 = vld [vmem:[%s760_s2 + $0x10] sm:$0xf] }
   0x4   :  { %55 = vadd.xlane.f32.xlu1 %v54_v3  ;;  %505 = vmatpush.xpose.msk.msra.mxu1 %vm75_vm2, %v19_v6  ;;  %v632_v8 = vld [vmem:[%s760_s2] sm:$0xf] }
   0x5   :  { %9 = vsyncpa [#allocation3], 0  ;;  %v51_v11 = vsel %vm50_vm1, %v632_v8, 0.0  ;;  %v57_v12 = vsel %vm50_vm1, %v637_v9, 0.0  ;;  %v63_v13 = vsel %vm50_vm1, %v642_v10, 0.0  ;;  %v29_v20 = vlaneseq  ;;  %s575_s8 = smov 10  }
   0x6   :  { %v653_v14 = vld [vmem:[%s760_s2 + $0x14] sm:$0xf]  ;;  %v658_v15 = vld [vmem:[%s760_s2 + $0x18] sm:$0xf]  ;;  %v663_v16 = vld [vmem:[%s760_s2 + $0x1c] sm:$0xf] }
   0x7   :  { %506 = vmatmul.msk.f32.vlgmr.msra.gmra.mxu1 %vm75_vm2, %v18_v7  ;;  %v66_v17 = vsel %vm50_vm1, %v653_v14, 0.0  ;;  %v69_v18 = vsel %vm50_vm1, %v658_v15, 0.0  ;;  %v72_v19 = vsel %vm50_vm1, %v663_v16, 0.0  ;;  %v34_v21 = vand.u32 127, %v29_v20  ;;  %s574_s2 = smov 6   ;;  %s576_s9 = smov 34  }
   0x8   :  { %v30_v22 = vshrl.u32 %v29_v20, 7  ;;  %v572_v29 = vmov 1.0   ;;  %vm118_vm12 = vcmask 1041409   ;;  %vm120_vm13 = vcmask 1042434   ;;  %s577_s10 = smov [#allocation2]   ;;  %s496_s14 = sshll.u32 %s762_s4, 4  ;;  %s497_s14 = int_to_ptr.hbm [resolvable:$true] %s496_s14 }
   0x9   :  { %v39_v23 = vadd.s32 1, %v34_v21  ;;  %v35_v25 = vmul.u32 6, %v34_v21  ;;  %vm763_vm14 = vcmask 195584   ;;  %vm122_vm15 = vcmask 1043459   ;;  %s494_s11 = sshll.u32 %s577_s10, 4  ;;  %s495_s11 = int_to_ptr.vmem [resolvable:$true] %s494_s11 }
   0xa   :  { %v32_v24 = vadd.s32 16, %v30_v22  ;;  %533 = vset.pattern.permute.xlu1 %v30_v22  ;;  %532 = vset.pattern.permute.xlu0 %v30_v22  ;;  %v31_v28 = vadd.s32 8, %v30_v22  ;;  %vm124_vm0 = vcmask 1044484   ;;  %vm126_vm2 = vcmask 1045509  }
   0xb   :  { %52 = vadd.xlane.f32.xlu0 %v51_v11  ;;  %64 = vadd.xlane.f32.xlu2 %v63_v13  ;;  %v40_v26 = vmul.u32 6, %v39_v23  ;;  %vm36_vm9 = vcmp.ge.s32.totalorder %v30_v22, %v35_v25  ;;  %v573_v63 = vmov 0.0  }
   0xc   :  { %58 = vadd.xlane.f32.xlu1 %v57_v12  ;;  %531 = vset.pattern.permute.xlu2 %v30_v22  ;;  %vm38_vm3 = vcmp.ge.s32.totalorder %v32_v24, %v35_v25  ;;  %vm37_vm6 = vcmp.ge.s32.totalorder %v31_v28, %v35_v25 }
   0xd   :  { %vm43_vm4 = vcmp.lt.s32.totalorder %v32_v24, %v40_v26  ;;  %vm42_vm7 = vcmp.lt.s32.totalorder %v31_v28, %v40_v26  ;;  %vm41_vm10 = vcmp.lt.s32.totalorder %v30_v22, %v40_v26 }
   0xe   :  { %vm671_vm5 = vmand %vm38_vm3, %vm43_vm4  ;;  %vm128_vm3 = vcmask 1046534   ;;  %vm764_vm4 = vcmask 1047559  }
   0xf   :  { %507 = vmatpush.msk.msrb.mxu1 %vm671_vm5, %v572_v29  ;;  %vm678_vm8 = vmand %vm37_vm6, %vm42_vm7  ;;  %vm136_vm6 = vcmask 31744  }
  0x10   :  { %vm685_vm11 = vmand %vm36_vm9, %vm41_vm10  ;;  %v48_v2 = vsel %vm678_vm8, 1.0, %v573_v63 }
  0x11   :  { %508 = vmatpush.msk.msrb.mxu1 %vm678_vm8, %v572_v29  ;;  %v47_v3 = vsel %vm685_vm11, 1.0, %v573_v63 }
  0x13   :  { %67 = vadd.xlane.f32.xlu0 %v66_v17  ;;  %73 = vadd.xlane.f32.xlu2 %v72_v19 }
  0x14   :  { %70 = vadd.xlane.f32.xlu1 %v69_v18  ;;  %509 = vmatpush.msk.msrb.mxu1 %vm685_vm11, %v572_v29 }
  0x76   :  { %v284_v32 = vpop.xlane.xlu0 %283  ;;  %v62_v35 = vpop.xlane.xlu2 %61 }
  0x77   :  { %v56_v33 = vpop.xlane.xlu1 %55  ;;  %v285_v34 = vsub.f32 %v606_v0, %v284_v32  ;;  %v113_v46 = vperm.slane %v62_v35, %v34_v21  ;;  %v49_v0 = vsel %vm671_vm5, 1.0, %v573_v63 }
  0x78   :  { %v111_v39 = vperm.slane %v56_v33, %v34_v21  ;;  %511 = vmatpush.xpose.msk.msra.mxu2 %vm136_vm6, %v49_v0  ;;  %521 = vmatpush.xpose.msk.msra.mxu0 %vm136_vm6, %v49_v0 }
  0x79   :  { %v286_v36 = vmul.f32 1.442695, %v285_v34 }
  0x7b   :  { %534 = vpow2.f32 %v286_v36 }
  0x7c   :  { %512 = vmatpush.xpose.msk.msra.mxu2 %vm136_vm6, %v48_v2  ;;  %522 = vmatpush.xpose.msk.msra.mxu0 %vm136_vm6, %v48_v2 }
  0x7e   :  { %v53_v37 = vpop.xlane.xlu0 %52  ;;  %v65_v42 = vpop.xlane.xlu2 %64 }
  0x7f   :  { %v59_v38 = vpop.xlane.xlu1 %58  ;;  %v110_v40 = vperm.slane %v53_v37, %v34_v21  ;;  %v114_v47 = vperm.slane %v65_v42, %v34_v21 }
  0x80   :  { %v112_v41 = vperm.slane %v59_v38, %v34_v21  ;;  %513 = vmatpush.xpose.msk.msra.mxu2 %vm136_vm6, %v47_v3  ;;  %523 = vmatpush.xpose.msk.msra.mxu0 %vm136_vm6, %v47_v3 }
  0x81   :  { %v693_v43 = vpop.eup %534  ;;  %v119_v44 = vsel %vm118_vm12, %v111_v39, %v110_v40 }
  0x82   :  { %v121_v45 = vsel %vm120_vm13, %v112_v41, %v119_v44  ;;  %510 = vmatmul.msk.f32.vlgmr.msrb.gmra.mxu1 %vm763_vm14, %v693_v43 }
  0x83   :  { %v123_v48 = vsel %vm122_vm15, %v113_v46, %v121_v45 }
  0x84   :  { %v125_v54 = vsel %vm124_vm0, %v114_v47, %v123_v48  ;;  %v99_v57 = vpop.f32.mrf.mxu1 }
  0x86   :  { %v68_v49 = vpop.xlane.xlu0 %67  ;;  %v74_v53 = vpop.xlane.xlu2 %73 }
  0x87   :  { %v71_v50 = vpop.xlane.xlu1 %70  ;;  %v115_v51 = vperm.slane %v68_v49, %v34_v21  ;;  %v117_v55 = vperm.slane %v74_v53, %v34_v21 }
  0x88   :  { %v116_v52 = vperm.slane %v71_v50, %v34_v21 }
  0x89   :  { %v127_v56 = vsel %vm126_vm2, %v115_v51, %v125_v54 }
  0x8a   :  { %v129_v58 = vsel %vm128_vm3, %v116_v52, %v127_v56 }
  0x8b   :  { %v131_v59 = vsel %vm764_vm4, %v117_v55, %v129_v58 }
  0x8c   :  { %v133_v60 = vmul.f32 %v131_v59, %v99_v57 }
  0x8e   :  { %vm134_vm7 = vcmp.eq.f32.partialorder %v133_v60, 0.0 }
  0x8f   :  { %v135_v61 = vsel %vm134_vm7, -1e+08, %v133_v60 }
  0x90   :  { %v137_v62 = vsel %vm136_vm6, %v135_v61, -inf }
  0x91   :  { %138 = vmax.xlane.f32.xlu0 %v137_v62 }
  0xff   :  { %v309_v5 = vpop.f32.mrf.mxu1 }
 0x100   :  { %536 = vrcp.f32 %v309_v5  ;;  %v323_v18 = vand.u32 2147483648, %v309_v5  ;;  %v321_v20 = vand.u32 2147483647, %v309_v5  ;;  %vm317_vm10 = vweird.f32 %v309_v5 }
 0x102   :  { %v324_v22 = vor.u32 1.1754944e-38, %v323_v18  ;;  %vm322_vm14 = vcmp.eq.f32.partialorder %v321_v20, 8.507059e+37 }
 0x104   :  { %v139_v6 = vpop.xlane.xlu0 %138 }
 0x105   :  { %v140_v7 = vsub.f32 %v135_v61, %v139_v6 }
 0x106   :  { %v537_v11 = vpop.eup %536 }
 0x107   :  { %v313_v12 = vmul.f32 %v537_v11, %v309_v5  ;;  %v141_v13 = vmul.f32 1.442695, %v140_v7  ;;  %vm318_vm9 = vweird.f32 %v537_v11 }
 0x108   :  { %vm319_vm7 = vmor %vm317_vm10, %vm318_vm9 }
 0x109   :  { %v314_v17 = vsub.f32 1.0, %v313_v12  ;;  %538 = vpow2.f32 %v141_v13 }
 0x10b   :  { %v315_v19 = vmul.f32 %v537_v11, %v314_v17 }
 0x10d   :  { %v316_v21 = vadd.f32 %v537_v11, %v315_v19 }
 0x10f   :  { %v539_v23 = vpop.eup %538  ;;  %v320_v24 = vsel %vm319_vm7, %v537_v11, %v316_v21  ;;  %vm377_vm7 = vcmask 1045504  }
 0x110   :  { %v325_v25 = vsel %vm322_vm14, %v324_v22, %v320_v24  ;;  %v143_v26 = vsel %vm136_vm6, %v539_v23, 0.0 }
 0x111   :  { %514 = vmatmul.msk.f32.vlgmr.msra.gmra.mxu2 %vm136_vm6, %v325_v25  ;;  %144 = vadd.xlane.f32.xlu1 %v143_v26 }
 0x184   :  { %v145_v28 = vpop.xlane.xlu1 %144 }
 0x185   :  { %540 = vrcp.f32 %v145_v28  ;;  %v157_v35 = vand.u32 2147483648, %v145_v28  ;;  %v155_v37 = vand.u32 2147483647, %v145_v28  ;;  %vm151_vm9 = vweird.f32 %v145_v28 }
 0x187   :  { %v158_v39 = vor.u32 1.1754944e-38, %v157_v35  ;;  %vm156_vm14 = vcmp.eq.f32.partialorder %v155_v37, 8.507059e+37 }
 0x18b   :  { %v541_v32 = vpop.eup %540 }
 0x18c   :  { %v147_v33 = vmul.f32 %v541_v32, %v145_v28  ;;  %vm152_vm4 = vweird.f32 %v541_v32 }
 0x18d   :  { %vm153_vm10 = vmor %vm151_vm9, %vm152_vm4  ;;  %vm486_vm4 = vcmask 474112  }
 0x18e   :  { %v148_v34 = vsub.f32 1.0, %v147_v33 }
 0x190   :  { %v149_v36 = vmul.f32 %v541_v32, %v148_v34 }
 0x192   :  { %v150_v38 = vadd.f32 %v541_v32, %v149_v36 }
 0x194   :  { %v154_v40 = vsel %vm153_vm10, %v541_v32, %v150_v38  ;;  %v355_v41 = vpop.f32.mrf.mxu2 }
 0x195   :  { %v159_v42 = vsel %vm156_vm14, %v158_v39, %v154_v40  ;;  %v358_v44 = vmul.f32 %v693_v43, %v355_v41 }
 0x196   :  { %v160_v45 = vmul.f32 %v539_v23, %v159_v42 }
 0x197   :  { %515 = vmatpush.msk.msra.mxu3 %vm377_vm7, %v358_v44 }
 0x198   :  { %v175_v46 = vperm.slane %v160_v45, 2  ;;  %v168_v47 = vperm.slane %v160_v45, 1  ;;  %v161_v48 = vperm.slane %v160_v45, 0  ;;  %v196_v43 = vperm.slane %v160_v45, 5 }
 0x199   :  { %517 = vmatpush.msk.msrb.mxu3 %vm671_vm5, %v572_v29  ;;  %v182_v49 = vperm.slane %v160_v45, 3  ;;  %v210_v50 = vperm.slane %v160_v45, 7  ;;  %v189_v51 = vperm.slane %v160_v45, 4  ;;  %v203_v27 = vperm.slane %v160_v45, 6 }
 0x19a   :  { %180 = vperm.xlu1 %533, %v175_v46   ;;  %173 = vperm.xlu0 %532, %v168_v47   ;;  %vm771_vm5 = vcmask 1047559  }
 0x19b   :  { %166 = vperm.xlu2 %531, %v161_v48   ;;  %518 = vmatpush.msk.msrb.mxu3 %vm678_vm8, %v572_v29  ;;  %vm772_vm8 = vcmask 195584  }
 0x19d   :  { %519 = vmatpush.msk.msrb.mxu3 %vm685_vm11, %v572_v29  ;;  %vm773_vm11 = vmmov %vm772_vm8 }
 0x1a2   :  { %201 = vperm.xlu1 %533, %v196_v43  }
 0x1a3   :  { %187 = vperm.xlu2 %531, %v182_v49  }
 0x1aa   :  { %215 = vperm.xlu1 %533, %v210_v50  }
 0x1ab   :  { %194 = vperm.xlu2 %531, %v189_v51  }
 0x1b3   :  { %208 = vperm.xlu2 %531, %v203_v27  }
 0x1bb   :  { %470 = vrot.lane.b32.xlu2 %v160_v45, %s574_s2 }
 0x1f5   :  { %v167_v52 = vpop.permute.xlu2 %166 }
 0x1f6   :  { %v217_v30 = vmul.f32 %v167_v52, %v632_v8 }
 0x1f8   :  { %v225_v54 = vsel %vm50_vm1, %v217_v30, 0.0 }
 0x1f9   :  { %v226_v55 = vrot.slane %v225_v54, 4 }
 0x1fb   :  { %v227_v58 = vadd.f32 %v226_v55, %v225_v54 }
 0x1fd   :  { %v188_v53 = vpop.permute.xlu2 %187 }
 0x1fe   :  { %v220_v29 = vmul.f32 %v188_v53, %v619_v4 }
 0x200   :  { %v246_v57 = vsel %vm50_vm1, %v220_v29, 0.0 }
 0x201   :  { %v247_v0 = vrot.slane %v246_v57, 4 }
 0x203   :  { %v248_v11 = vadd.f32 %v247_v0, %v246_v57 }
 0x205   :  { %v195_v31 = vpop.permute.xlu2 %194  ;;  %v249_v22 = vrot.slane %v248_v11, 2 }
 0x206   :  { %v221_v56 = vmul.f32 %v195_v31, %v642_v10  ;;  %v228_v10 = vrot.slane %v227_v58, 2 }
 0x207   :  { %v250_v36 = vadd.f32 %v249_v22, %v248_v11 }
 0x208   :  { %v253_v8 = vsel %vm50_vm1, %v221_v56, 0.0 }
 0x209   :  { %v254_v7 = vrot.slane %v253_v8, 4  ;;  %v251_v46 = vrot.slane %v250_v36, 1 }
 0x20b   :  { %v255_v20 = vadd.f32 %v254_v7, %v253_v8  ;;  %v252_v53 = vadd.f32 %v251_v46, %v250_v36 }
 0x20c   :  { %v181_v59 = vpop.permute.xlu1 %180  ;;  %v174_v60 = vpop.permute.xlu0 %173 }
 0x20d   :  { %v219_v61 = vmul.f32 %v181_v59, %v637_v9  ;;  %v218_v62 = vmul.f32 %v174_v60, %v611_v1  ;;  %v209_v63 = vpop.permute.xlu2 %208  ;;  %v229_v1 = vadd.f32 %v228_v10, %v227_v58  ;;  %v256_v33 = vrot.slane %v255_v20, 2 }
 0x20e   :  { %v223_v2 = vmul.f32 %v209_v63, %v658_v15 }
 0x20f   :  { %v239_v4 = vsel %vm50_vm1, %v219_v61, 0.0  ;;  %v232_v3 = vsel %vm50_vm1, %v218_v62, 0.0  ;;  %v230_v26 = vrot.slane %v229_v1, 1  ;;  %v257_v42 = vadd.f32 %v256_v33, %v255_v20 }
 0x210   :  { %v240_v5 = vrot.slane %v239_v4, 4  ;;  %v233_v6 = vrot.slane %v232_v3, 4  ;;  %v267_v9 = vsel %vm50_vm1, %v223_v2, 0.0 }
 0x211   :  { %v268_v21 = vrot.slane %v267_v9, 4  ;;  %v231_v39 = vadd.f32 %v230_v26, %v229_v1  ;;  %v258_v51 = vrot.slane %v257_v42, 1 }
 0x212   :  { %v241_v12 = vadd.f32 %v240_v5, %v239_v4  ;;  %v234_v13 = vadd.f32 %v233_v6, %v232_v3 }
 0x213   :  { %v269_v35 = vadd.f32 %v268_v21, %v267_v9  ;;  %v259_v55 = vadd.f32 %v258_v51, %v257_v42 }
 0x214   :  { %v242_v17 = vrot.slane %v241_v12, 2  ;;  %v235_v18 = vrot.slane %v234_v13, 2  ;;  %v202_v19 = vpop.permute.xlu1 %201 }
 0x215   :  { %v222_v15 = vmul.f32 %v202_v19, %v653_v14  ;;  %v270_v14 = vrot.slane %v269_v35, 2  ;;  %v471_v63 = vpop.permute.xlu2 %470 }
 0x216   :  { %v243_v23 = vadd.f32 %v242_v17, %v241_v12  ;;  %v236_v24 = vadd.f32 %v235_v18, %v234_v13 }
 0x217   :  { %v260_v25 = vsel %vm50_vm1, %v222_v15, 0.0  ;;  %v271_v27 = vadd.f32 %v270_v14, %v269_v35 }
 0x218   :  { %v237_v28 = vrot.slane %v236_v24, 1  ;;  %v261_v32 = vrot.slane %v260_v25, 4  ;;  %v244_v34 = vrot.slane %v243_v23, 1 }
 0x21a   :  { %v238_v37 = vadd.f32 %v237_v28, %v236_v24  ;;  %v262_v38 = vadd.f32 %v261_v32, %v260_v25  ;;  %v245_v44 = vadd.f32 %v244_v34, %v243_v23 }
 0x21c   :  { %v263_v40 = vrot.slane %v262_v38, 2  ;;  %v216_v41 = vpop.permute.xlu1 %215  ;;  %v367_v47 = vsel %vm118_vm12, %v238_v37, %v231_v39 }
 0x21d   :  { %v224_v45 = vmul.f32 %v216_v41, %v663_v16  ;;  %v368_v52 = vsel %vm120_vm13, %v245_v44, %v367_v47  ;;  %v272_v16 = vrot.slane %v271_v27, 1 }
 0x21e   :  { %v264_v48 = vadd.f32 %v263_v40, %v262_v38  ;;  %v369_v29 = vsel %vm122_vm15, %v252_v53, %v368_v52 }
 0x21f   :  { %v274_v43 = vsel %vm50_vm1, %v224_v45, 0.0  ;;  %v370_v57 = vsel %vm124_vm0, %v259_v55, %v369_v29  ;;  %v273_v60 = vadd.f32 %v272_v16, %v271_v27  ;;  %vm374_vm1 = vcmask 48128  }
 0x220   :  { %v265_v49 = vrot.slane %v264_v48, 1  ;;  %v275_v50 = vrot.slane %v274_v43, 4 }
 0x222   :  { %v276_v30 = vadd.f32 %v275_v50, %v274_v43  ;;  %v266_v54 = vadd.f32 %v265_v49, %v264_v48 }
 0x224   :  { %v277_v31 = vrot.slane %v276_v30, 2  ;;  %v371_v59 = vsel %vm126_vm2, %v266_v54, %v370_v57  ;;  %vm482_vm2 = vcmask 80896  }
 0x225   :  { %v372_v62 = vsel %vm128_vm3, %v273_v60, %v371_v59  ;;  %vm484_vm3 = vcmask 277504  }
 0x226   :  { %v278_v56 = vadd.f32 %v277_v31, %v276_v30 }
 0x228   :  { %v279_v58 = vrot.slane %v278_v56, 1 }
 0x22a   :  { %v280_v61 = vadd.f32 %v279_v58, %v278_v56 }
 0x22c   :  { %v373_v0 = vsel %vm771_vm5, %v280_v61, %v372_v62 }
 0x22d   :  { %516 = vmatmul.msk.f32.vlgmr.msra.gmra.mxu3 %vm374_vm1, %v373_v0  ;;  %v481_v8 = vsel %vm374_vm1, %v373_v0, %v471_v63 }
 0x2b0   :  { %v398_v2 = vpop.f32.mrf.mxu3 }
 0x2b1   :  { %474 = vrot.lane.b32.xlu1 %v398_v2, %s575_s8  ;;  %v401_v4 = vsel %vm772_vm8, %v398_v2, -inf }
 0x2b2   :  { %402 = vmax.xlane.f32.xlu0 %v401_v4 }
 0x323   :  { %v475_v23 = vpop.permute.xlu1 %474 }
 0x324   :  { %v483_v24 = vsel %vm482_vm2, %v481_v8, %v475_v23 }
 0x325   :  { %v403_v3 = vpop.xlane.xlu0 %402 }
 0x326   :  { %v404_v10 = vsub.f32 %v398_v2, %v403_v3 }
 0x328   :  { %v405_v5 = vmul.f32 1.442695, %v404_v10 }
 0x32a   :  { %542 = vpow2.f32 %v405_v5 }
 0x330   :  { %v543_v6 = vpop.eup %542 }
 0x331   :  { %520 = vmatmul.msk.f32.vlgmr.msrb.gmra.mxu3 %vm773_vm11, %v543_v6 }
 0x3b4   :  { %v427_v7 = vpop.f32.mrf.mxu3 }
 0x3b5   :  { %544 = vrcp.f32 %v427_v7  ;;  %v441_v9 = vand.u32 2147483648, %v427_v7  ;;  %v439_v17 = vand.u32 2147483647, %v427_v7  ;;  %vm435_vm13 = vweird.f32 %v427_v7 }
 0x3b7   :  { %v442_v19 = vor.u32 1.1754944e-38, %v441_v9  ;;  %vm440_vm0 = vcmp.eq.f32.partialorder %v439_v17, 8.507059e+37 }
 0x3bb   :  { %v545_v11 = vpop.eup %544 }
 0x3bc   :  { %v431_v12 = vmul.f32 %v545_v11, %v427_v7  ;;  %vm436_vm12 = vweird.f32 %v545_v11 }
 0x3bd   :  { %vm437_vm15 = vmor %vm435_vm13, %vm436_vm12 }
 0x3be   :  { %v432_v13 = vsub.f32 1.0, %v431_v12 }
 0x3c0   :  { %v433_v1 = vmul.f32 %v545_v11, %v432_v13 }
 0x3c2   :  { %v434_v18 = vadd.f32 %v545_v11, %v433_v1 }
 0x3c4   :  { %v438_v20 = vsel %vm437_vm15, %v545_v11, %v434_v18 }
 0x3c5   :  { %v443_v21 = vsel %vm440_vm0, %v442_v19, %v438_v20 }
 0x3c6   :  { %524 = vmatmul.msk.f32.vlgmr.msra.gmra.mxu0 %vm136_vm6, %v443_v21 }
 0x443   :  { %v464_v15 = vpop.f32.mrf.mxu0 }
 0x444   :  { %v467_v22 = vmul.f32 %v543_v6, %v464_v15 }
 0x446   :  { %478 = vrot.lane.b32.xlu2 %v467_v22, %s576_s9 }
 0x4a0   :  { %v479_v25 = vpop.permute.xlu2 %478 }
 0x4a1   :  { %v485_v26 = vsel %vm484_vm3, %v483_v24, %v479_v25 }
 0x4a2   :  { %v487_v28 = vsel %vm486_vm4, %v485_v26, 0.0 }
 0x4a3   :  { %488 = vst [vmem:[#allocation2] sm:$0xff] %v487_v28 }
 0x4a4   :  { %499 = dma.vmem_to_hbm [thread:$0]  %s495_s11, 128, %s497_s14, [#allocation3]  }
 0x4a5   :  { %570 = dma.done.wait [#allocation3], 128  }
 0x4a6   :  { %571 = vsyncadd [#allocation3], 4294967168 }
 0x4a7   :  { %504 = vsyncpa [#allocation3], 1 }

</bundles_post_ra>
